<compile_context>
chip_gen: v6e
topology: v6e:2x2x1
jax: 0.10.0
libtpu: 0.0.40
codegen_flags: <defaults>
</compile_context>

<pallas_src>
import jax
import jax.numpy as jnp
from jax.experimental import pallas as pl
from jax.experimental.pallas import tpu as pltpu

C_HID = 32 + 32 + 32 + 2          # 98  (hidden width of the MLP)
C_IN = C_HID * 2                  # 196 (channels after concatenating branches)


def _round_up(x, m):
    return (x + m - 1) // m * m


def _cdiv(a, b):
    return -(-a // b)


def _make_fusion_kernel(chans, offsets):
    """Kernel over one (batch, spatial-tile) grid step.

    Per-step ref shapes:
      feat_i  : (1, c_i, TP)   channels-first, pixels on the lane axis
      w1      : (C_HID, C_IN)  first 1x1-conv weight (f32, resident)
      w2      : (dim, C_HID)   second 1x1-conv weight (f32, resident)
      out     : (1, dim, TP)   lane-dense (TP multiple of 128)
      scratch : (C_IN, TP) f32 assembly buffer (only when >1 branch)
    """
    n_feats = len(chans)
    use_scratch = n_feats > 1

    def kernel(*refs):
        feat_refs = refs[:n_feats]
        w1_ref = refs[n_feats]
        w2_ref = refs[n_feats + 1]
        o_ref = refs[n_feats + 2]

        if use_scratch:
            x_ref = refs[n_feats + 3]
            # Assemble concat(feats) in VMEM at static channel offsets so the
            # first conv is a single K = C_IN MXU matmul (no padded tiny-K
            # per-branch matmuls, no `h +=` chain on the VPU).  All branch
            # rows are rewritten every step, so no stale data survives.
            for i in range(n_feats):
                x_ref[offsets[i]:offsets[i] + chans[i], :] = (
                    feat_refs[i][0].astype(jnp.float32))
            x = x_ref[...]
        else:
            x = feat_refs[0][0].astype(jnp.float32)

        # h = relu(W1 @ x) : (C_HID, TP), f32 accumulation on the MXU.
        h = jnp.dot(w1_ref[...], x, preferred_element_type=jnp.float32)
        h = jnp.maximum(h, 0.0)

        # y = W2 @ h : (dim, TP).  dim is tiny (<1% of FLOPs); lanes stay dense.
        y = jnp.dot(w2_ref[...], h, preferred_element_type=jnp.float32)
        o_ref[0] = y.astype(o_ref.dtype)

    return kernel


def complement_feature_fusion(in_feats, w1, w2, *, tile_p_max=8192,
                              compute_dtype=None, min_grid_steps=4,
                              vmem_budget_bytes=40 * 1024 * 1024):
    """Forward pass of ComplementFeatureFusionModule.

    in_feats: list of NCHW arrays whose channel counts sum to w1.shape[1].
    w1: (C_HID, C_IN) 1x1-conv weight (kernel dims squeezed), no bias.
    w2: (dim, C_HID)  1x1-conv weight, no bias.
    compute_dtype: optional HBM storage dtype for the feature maps (e.g.
      jnp.bfloat16) to halve HBM traffic; accumulation is always f32 and the
      output keeps the input dtype.
    Returns attn in NCHW: (B, dim, H, W).
    """
    n = len(in_feats)
    B, _, H, W = in_feats[0].shape
    chans = [int(f.shape[1]) for f in in_feats]
    c_in = sum(chans)
    c_hid = int(w1.shape[0])
    dim = int(w2.shape[0])
    assert c_in == int(w1.shape[1]), (c_in, w1.shape)
    assert c_hid == int(w2.shape[1]), (c_hid, w2.shape)

    out_dtype = in_feats[0].dtype
    feat_dtype = jnp.dtype(compute_dtype) if compute_dtype is not None \
        else jnp.dtype(out_dtype)
    feat_isz = feat_dtype.itemsize
    out_isz = jnp.dtype(out_dtype).itemsize

    S = H * W

    # ---- spatial (lane) tile selection --------------------------------------
    tile_p = min(_round_up(tile_p_max, 128), _round_up(S, 128))

    # Keep at least ~min_grid_steps grid steps so both v7x TensorCores (grid is
    # sharded via the "parallel" axes) get work; best effort at small shapes.
    if B * _cdiv(S, tile_p) < min_grid_steps:
        per_b = _cdiv(min_grid_steps, B)
        tile_p = max(128, _round_up(_cdiv(S, per_b), 128))

    def _vmem_need(tp):
        dbl = 2  # double-buffered pipeline copies
        feat_b = dbl * sum(chans) * tp * feat_isz
        out_b = dbl * dim * tp * out_isz
        scratch_b = (c_in * tp * 4) if n > 1 else 0        # f32 assembly buffer
        h_b = 2 * c_hid * tp * 4                           # h + relu/matmul temps
        w_b = dbl * (c_hid * c_in + dim * c_hid) * 4
        return feat_b + out_b + scratch_b + h_b + w_b

    # Fit the v7x 64-MiB/TC VMEM (budget leaves headroom); v5e/v6e have 128 MiB.
    while tile_p > 128 and _vmem_need(tile_p) > vmem_budget_bytes:
        tile_p -= 128

    S_pad = _round_up(S, tile_p)

    # ---- operands ------------------------------------------------------------
    # NCHW -> (B, C, H*W): pure reshape, no transpose, no HBM concat.  Padded
    # pixels are zero -> stay zero through the bias-free convs + ReLU.
    feats2d = []
    for f in in_feats:
        f2 = f.reshape(B, f.shape[1], S).astype(feat_dtype)
        if S_pad != S:
            f2 = jnp.pad(f2, ((0, 0), (0, 0), (0, S_pad - S)))
        feats2d.append(f2)

    # Weights are tiny -> keep resident in f32 (matches f32 accumulation).
    w1_f = w1.astype(jnp.float32)
    w2_f = w2.astype(jnp.float32)

    # Static channel offsets of each branch inside the assembled (c_in, TP) tile.
    offsets = []
    off = 0
    for c in chans:
        offsets.append(off)
        off += c

    grid = (B, S_pad // tile_p)

    in_specs = (
        [pl.BlockSpec((1, c, tile_p), lambda b, j: (b, 0, j)) for c in chans]
        + [pl.BlockSpec((c_hid, c_in), lambda b, j: (0, 0)),
           pl.BlockSpec((dim, c_hid), lambda b, j: (0, 0))]
    )
    out_spec = pl.BlockSpec((1, dim, tile_p), lambda b, j: (b, 0, j))
    scratch_shapes = ([pltpu.VMEM((c_in, tile_p), jnp.float32)] if n > 1 else [])

    need = _vmem_need(tile_p)
    vmem_limit = int(min(max(int(1.25 * need), 32 * 1024 * 1024),
                         48 * 1024 * 1024))

    flops = 2 * B * S_pad * (c_in * c_hid + c_hid * dim)
    bytes_accessed = (B * S_pad * (sum(chans) * feat_isz + dim * out_isz)
                      + (c_hid * c_in + dim * c_hid) * 4)

    out3d = pl.pallas_call(
        _make_fusion_kernel(tuple(chans), tuple(offsets)),
        out_shape=jax.ShapeDtypeStruct((B, dim, S_pad), out_dtype),
        grid_spec=pltpu.PrefetchScalarGridSpec(
            num_scalar_prefetch=0,
            grid=grid,
            in_specs=in_specs,
            out_specs=out_spec,
            scratch_shapes=scratch_shapes,
        ),
        compiler_params=pltpu.CompilerParams(
            dimension_semantics=("parallel", "parallel"),
            vmem_limit_bytes=vmem_limit,
        ),
        cost_estimate=pl.CostEstimate(
            flops=flops, transcendentals=0, bytes_accessed=bytes_accessed),
    )(*feats2d, w1_f, w2_f)

    # (B, dim, S_pad) -> strip padding -> NCHW (pure reshape, no transpose).
    return out3d[:, :, :S].reshape(B, dim, H, W)


def _reference(in_feats, w1, w2):
    x = jnp.concatenate(in_feats, axis=1)
    h = jnp.einsum('bchw,oc->bohw', x, w1)
    h = jnp.maximum(h, 0.0)
    return jnp.einsum('bchw,oc->bohw', h, w2)


if __name__ == "__main__":
    key = jax.random.PRNGKey(0)
    k1, k2, k3, k4 = jax.random.split(key, 4)

    # Two input branches of 98 channels each (concat -> 196), B=2, 16x16, dim=2.
    B, H, W = 2, 16, 16
    dim = 2
    feat_a = jax.random.normal(k1, (B, C_HID, H, W), dtype=jnp.float32)
    feat_b = jax.random.normal(k2, (B, C_HID, H, W), dtype=jnp.float32)

    # Deterministic parameter init (kaiming-uniform-like scaling for 1x1 convs).
    bound1 = 1.0 / (C_IN ** 0.5)
    bound2 = 1.0 / (C_HID ** 0.5)
    w1 = jax.random.uniform(k3, (C_HID, C_IN), jnp.float32, -bound1, bound1)
    w2 = jax.random.uniform(k4, (dim, C_HID), jnp.float32, -bound2, bound2)

    ref = _reference([feat_a, feat_b], w1, w2)

    # f32 path (exact-dtype check).
    out = complement_feature_fusion([feat_a, feat_b], w1, w2)
    out = jax.block_until_ready(out)
    assert out.shape == (B, dim, H, W)
    assert jnp.allclose(out, ref, atol=1e-4, rtol=1e-4), \
        float(jnp.max(jnp.abs(out - ref)))

    # bf16-in-HBM path (halves HBM traffic; f32 accumulation, looser tolerance).
    out_bf16 = complement_feature_fusion([feat_a, feat_b], w1, w2,
                                         compute_dtype=jnp.bfloat16)
    out_bf16 = jax.block_until_ready(out_bf16)
    assert out_bf16.shape == (B, dim, H, W)
    assert jnp.allclose(out_bf16, ref, atol=5e-2, rtol=5e-2), \
        float(jnp.max(jnp.abs(out_bf16 - ref)))

    print("KERNEL_OK")
</pallas_src>

<mosaic_0001>
module attributes {stable_mosaic.version = 11 : i64} {
  func.func @kernel(%arg0: i32, %arg1: i32, %arg2: memref<1x98x128xf32, #tpu.memory_space<vmem>>, %arg3: memref<1x98x128xf32, #tpu.memory_space<vmem>>, %arg4: memref<98x196xf32, #tpu.memory_space<vmem>>, %arg5: memref<2x98xf32, #tpu.memory_space<vmem>>, %arg6: memref<1x2x128xf32, #tpu.memory_space<vmem>>, %arg7: memref<196x128xf32, #tpu.memory_space<vmem>>) attributes {dimension_semantics = [#tpu.dimension_semantics<parallel>, #tpu.dimension_semantics<parallel>], iteration_bounds = array<i64: 2, 2>, scalar_prefetch = 0 : i64, scratch_operands = 1 : i64, tpu.core_type = #tpu.core_type<tc>, window_params = [{transform_indices = @transform_0, window_bounds = array<i64: 1, 98, 128>}, {transform_indices = @transform_1, window_bounds = array<i64: 1, 98, 128>}, {pipeline_mode = #tpu.pipeline_mode<synchronous>, transform_indices = @transform_2, window_bounds = array<i64: 98, 196>}, {pipeline_mode = #tpu.pipeline_mode<synchronous>, transform_indices = @transform_3, window_bounds = array<i64: 2, 98>}, {transform_indices = @transform_4, window_bounds = array<i64: 1, 2, 128>}]} {
    %c0 = arith.constant 0 : index
    %c0_0 = arith.constant 0 : index
    %c0_1 = arith.constant 0 : index
    %0 = vector.load %arg2[%c0, %c0_0, %c0_1] : memref<1x98x128xf32, #tpu.memory_space<vmem>>, vector<1x98x128xf32>
    %1 = vector.shape_cast %0 : vector<1x98x128xf32> to vector<98x128xf32>
    %c0_2 = arith.constant 0 : index
    %c0_3 = arith.constant 0 : index
    %2 = vector.load %arg7[%c0_2, %c0_3] : memref<196x128xf32, #tpu.memory_space<vmem>>, vector<98x128xf32>
    tpu.vector_store %arg7[%c0_2, %c0_3], %1 {strides = array<i32>} : memref<196x128xf32, #tpu.memory_space<vmem>>, vector<98x128xf32>,
    %c0_4 = arith.constant 0 : index
    %c0_5 = arith.constant 0 : index
    %c0_6 = arith.constant 0 : index
    %3 = vector.load %arg3[%c0_4, %c0_5, %c0_6] : memref<1x98x128xf32, #tpu.memory_space<vmem>>, vector<1x98x128xf32>
    %4 = vector.shape_cast %3 : vector<1x98x128xf32> to vector<98x128xf32>
    %c98 = arith.constant 98 : index
    %c0_7 = arith.constant 0 : index
    %5 = vector.load %arg7[%c98, %c0_7] : memref<196x128xf32, #tpu.memory_space<vmem>>, vector<98x128xf32>
    tpu.vector_store %arg7[%c98, %c0_7], %4 {strides = array<i32>} : memref<196x128xf32, #tpu.memory_space<vmem>>, vector<98x128xf32>,
    %c0_8 = arith.constant 0 : index
    %c0_9 = arith.constant 0 : index
    %6 = vector.load %arg7[%c0_8, %c0_9] : memref<196x128xf32, #tpu.memory_space<vmem>>, vector<196x128xf32>
    %c0_10 = arith.constant 0 : index
    %c0_11 = arith.constant 0 : index
    %7 = vector.load %arg4[%c0_10, %c0_11] : memref<98x196xf32, #tpu.memory_space<vmem>>, vector<98x196xf32>
    %cst = arith.constant dense<0.000000e+00> : vector<98x128xf32>
    %8 = tpu.matmul %7, %6, %cst {dimension_numbers = #tpu.dot_dimension_numbers<[1], [0], [0], [1], [0, 0, 1, 1], [], []>} : vector<98x196xf32>, vector<196x128xf32>, vector<98x128xf32> -> vector<98x128xf32>
    %cst_12 = arith.constant 0.000000e+00 : f32
    %9 = vector.broadcast %cst_12 : f32 to vector<98x128xf32>
    %10 = arith.maximumf %8, %9 : vector<98x128xf32>
    %c0_13 = arith.constant 0 : index
    %c0_14 = arith.constant 0 : index
    %11 = vector.load %arg5[%c0_13, %c0_14] : memref<2x98xf32, #tpu.memory_space<vmem>>, vector<2x98xf32>
    %cst_15 = arith.constant dense<0.000000e+00> : vector<2x128xf32>
    %12 = tpu.matmul %11, %10, %cst_15 {dimension_numbers = #tpu.dot_dimension_numbers<[1], [0], [0], [1], [0, 0, 1, 1], [], []>} : vector<2x98xf32>, vector<98x128xf32>, vector<2x128xf32> -> vector<2x128xf32>
    %c0_16 = arith.constant 0 : index
    %c0_17 = arith.constant 0 : index
    %c0_18 = arith.constant 0 : index
    %13 = vector.load %arg6[%c0_16, %c0_17, %c0_18] : memref<1x2x128xf32, #tpu.memory_space<vmem>>, vector<1x2x128xf32>
    %14 = vector.shape_cast %13 : vector<1x2x128xf32> to vector<2x128xf32>
    %15 = vector.shape_cast %12 : vector<2x128xf32> to vector<1x2x128xf32>
    tpu.vector_store %arg6[%c0_16, %c0_17, %c0_18], %15 {strides = array<i32>} : memref<1x2x128xf32, #tpu.memory_space<vmem>>, vector<1x2x128xf32>,
    return
  }
  func.func @transform_0(%arg0: i32, %arg1: i32) -> (i32, i32, i32) {
    %c0_i32 = arith.constant 0 : i32
    %c0_i32_0 = arith.constant 0 : i32
    return %arg0, %c0_i32, %arg1 : i32, i32, i32
  }
  func.func @transform_1(%arg0: i32, %arg1: i32) -> (i32, i32, i32) {
    %c0_i32 = arith.constant 0 : i32
    %c0_i32_0 = arith.constant 0 : i32
    return %arg0, %c0_i32, %arg1 : i32, i32, i32
  }
  func.func @transform_2(%arg0: i32, %arg1: i32) -> (i32, i32) {
    %c0_i32 = arith.constant 0 : i32
    %c0_i32_0 = arith.constant 0 : i32
    %c0_i32_1 = arith.constant 0 : i32
    return %c0_i32, %c0_i32_0 : i32, i32
  }
  func.func @transform_3(%arg0: i32, %arg1: i32) -> (i32, i32) {
    %c0_i32 = arith.constant 0 : i32
    %c0_i32_0 = arith.constant 0 : i32
    %c0_i32_1 = arith.constant 0 : i32
    return %c0_i32, %c0_i32_0 : i32, i32
  }
  func.func @transform_4(%arg0: i32, %arg1: i32) -> (i32, i32, i32) {
    %c0_i32 = arith.constant 0 : i32
    %c0_i32_0 = arith.constant 0 : i32
    return %arg0, %c0_i32, %arg1 : i32, i32, i32
  }
}

</mosaic_0001>

<bundles_post_ra>
// kernel: tpu_custom_call.1
= control target key start
LH: loop header
LB: loop body
LE: loop exit
PB: predicated region body
PF: predicated region fallthrough
CT: control target
= control target key end

     0   :  { %9 = vsyncpa [#allocation6], 0  ;;  %s1469_s0 = inlined_call_operand.vmem [shape: f32[2,98,256], index: 0, kind: input, shape index: {}]   ;;  %s1470_s1 = inlined_call_operand.vmem [shape: f32[2,98,256], index: 1, kind: input, shape index: {}]   ;;  %s1471_s2 = inlined_call_operand.vmem [shape: f32[98,196], index: 2, kind: input, shape index: {}]   ;;  %s1472_s3 = inlined_call_operand.vmem [shape: f32[2,98], index: 3, kind: input, shape index: {}]   ;;  %s1473_s4 = inlined_call_operand.hbm [shape: f32[2,2,256], index: 4, kind: output, shape index: {}]  }
   0x1   :  { %11 = vsyncpa [#allocation6 + $0x1], 0  ;;  %s1162_s15 = smov 0   ;;  %s1164_s16 = smov 0  }
   0x2   :  { %s1166_s17 = smov 0   ;;  %s1168_s18 = smov 0  }
   0x3   :  { %s1170_s19 = smov 0   ;;  %s1172_s20 = smov 0  }
   0x4   :  { %s1174_s21 = smov 0   ;;  %s1176_s22 = smov 0  }
   0x5 LB: > { %s890_s23 = sadd.s32 4294967295, %s1132_s22   ;;  %s891_s24 = sadd.s32 4294967294, %s1132_s22   ;;  %s1132_s22 = sphi %s1176_s22, %s17_s22   ;;  %s1128_s21 = sphi %s1174_s21, %s1483_s21   ;;  %s1124_s20 = sphi %s1172_s20, %s1482_s20   ;;  %s1120_s19 = sphi %s1170_s19, %s1481_s19   ;;  %s1116_s18 = sphi %s1168_s18, %s1480_s18   ;;  %s1112_s17 = sphi %s1166_s17, %s1479_s17   ;;  %s1108_s16 = sphi %s1164_s16, %s1478_s16   ;;  %s1104_s15 = sphi %s1162_s15, %s1477_s15  }
   0x6   : > { %s26_s25 = sadd.s32 1, %s1124_s20  ;;  %s29_s26 = sadd.s32 1, %s1128_s21 }
   0x7   : > { %p27_p0 = scmp.ge.s32.totalorder %s26_s25, 2  ;;  %p45_p1 = scmp.ne.s32.totalorder %s1112_s17, %s1108_s16 }
   0x8   : > { %p46_p2 = scmp.eq.s32.totalorder %s1132_s22, 0  ;;  %p147_p5 = scmp.eq.s32.totalorder %s890_s23, 3 }
   0x9   : > { %s1485_s25 = smov (%p27_p0, %s26_s25), 0  ;;  %s1487_s26 = smov (!%p27_p0, %s29_s26), %s1128_s21 }
   0xa   : > { %s34_s27 = ssub.s32 %s1124_s20, %s1485_s25  ;;  %p1214_p3 = por %p46_p2, %p45_p1 }
   0xb   : > { %p31_p4 = scmp.ge.s32.totalorder %s1487_s26, 2  ;;  %p152_p6 = scmp.ne.s32.totalorder %s1108_s16, %s1104_s15 }
   0xc   : > { %p153_p7 = scmp.eq.s32.totalorder %s891_s24, 3  ;;  %p1222_p8 = por %p147_p5, %p45_p1 }
   0xd   : > { %s1489_s26 = smov (%p31_p4, %s1487_s26), 0  ;;  %s38_s7 = sadd.s32 1, %s1112_s17 }
   0xe   : > { %p1226_p9 = por %p153_p7, %p152_p6  ;;  %s33_s5 = ssub.s32 %s1128_s21, %s1489_s26 }
   0xf   : > { %s35_s6 = sor.u32 %s34_s27, %s33_s5  ;;  %p893_p11 = scmp.ge.s32.totalorder %s1132_s22, 4 }
  0x10   : > { %p36_p10 = scmp.eq.s32.totalorder %s35_s6, 0 }
  0x11   : > { %175 = sbr.rel (%p893_p11) target bundleno = 50 (0x32), region = 24 }
  0x12   : > { %s1234_s8 = scalar_select %p36_p10, %s1112_s17, %s38_s7  }
  0x16   : > { %178 = sbr.rel (!%p1214_p3) target bundleno = 36 (0x24), region = 28  ;;  %s180_s9 = sand.u32 (%p1214_p3), 1, %s1112_s17  }
  0x17   : > { %s963_s10 = smul.u32 (%p1214_p3), 26, %s1128_s21 }
  0x18   : > { %s962_s11 = smul.u32 (%p1214_p3), 104, %s180_s9 }
  0x19   : > { %s184_s12 = sadd.s32 (%p1214_p3), %s1124_s20, %s963_s10 }
  0x1a   : > { %s894_s13 = sshll.u32 (%p1214_p3), %s184_s12, 3  ;;  %s182_s27 = scalar_lea.vmem (%p1214_p3), [#allocation3], %s962_s11 }
  0x1b   : > { %s186_s24 = scalar_lea.vmem %s1469_s0, %s894_s13 }
  0x1c   : > { %v239_v0 = vld [vmem:[%s186_s24] sm:$0xff]  ;;  %v241_v1 = vld [vmem:[%s186_s24 + $0x10] sm:$0xff] }
  0x1d   : > { %v243_v2 = vld [vmem:[%s186_s24 + $0x20] sm:$0xff]  ;;  %240 = vst [vmem:[%s182_s27] sm:$0xff] %v239_v0  ;;  %242 = vst [vmem:[%s182_s27 + $0x8] sm:$0xff] %v241_v1  ;;  %v245_v3 = vld [vmem:[%s186_s24 + $0x30] sm:$0xff] }
  0x1e   : > { %244 = vst [vmem:[%s182_s27 + $0x10] sm:$0xff] %v243_v2  ;;  %v247_v4 = vld [vmem:[%s186_s24 + $0x40] sm:$0xff]  ;;  %v249_v5 = vld [vmem:[%s186_s24 + $0x50] sm:$0xff]  ;;  %246 = vst [vmem:[%s182_s27 + $0x18] sm:$0xff] %v245_v3 }
  0x1f   : > { %248 = vst [vmem:[%s182_s27 + $0x20] sm:$0xff] %v247_v4  ;;  %250 = vst [vmem:[%s182_s27 + $0x28] sm:$0xff] %v249_v5  ;;  %v251_v6 = vld [vmem:[%s186_s24 + $0x60] sm:$0xff]  ;;  %v253_v7 = vld [vmem:[%s186_s24 + $0x70] sm:$0xff] }
  0x20   : > { %v255_v8 = vld [vmem:[%s186_s24 + $0x80] sm:$0xff]  ;;  %252 = vst [vmem:[%s182_s27 + $0x30] sm:$0xff] %v251_v6  ;;  %254 = vst [vmem:[%s182_s27 + $0x38] sm:$0xff] %v253_v7  ;;  %v257_v9 = vld [vmem:[%s186_s24 + $0x90] sm:$0xff] }
  0x21   : > { %256 = vst [vmem:[%s182_s27 + $0x40] sm:$0xff] %v255_v8  ;;  %v259_v10 = vld [vmem:[%s186_s24 + $0xa0] sm:$0xff]  ;;  %v261_v11 = vld [vmem:[%s186_s24 + $0xb0] sm:$0xff]  ;;  %258 = vst [vmem:[%s182_s27 + $0x48] sm:$0xff] %v257_v9 }
  0x22   : > { %260 = vst [vmem:[%s182_s27 + $0x50] sm:$0xff] %v259_v10  ;;  %262 = vst [vmem:[%s182_s27 + $0x58] sm:$0xff] %v261_v11  ;;  %v263_v12 = vld [vmem:[%s186_s24 + $0xc0] sm:$0xff] }
  0x23   : > { %264 = vst [vmem:[%s182_s27 + $0x60] sm:$0xff] %v263_v12 }
  0x24 PF: > { %270 = sbr.rel (!%p1214_p3) target bundleno = 50 (0x32), region = 66  ;;  %s272_s5 = sand.u32 (%p1214_p3), 1, %s1112_s17  }
  0x25   : > { %s965_s6 = smul.u32 (%p1214_p3), 26, %s1128_s21 }
  0x26   : > { %s964_s7 = smul.u32 (%p1214_p3), 104, %s272_s5 }
  0x27   : > { %s276_s9 = sadd.s32 (%p1214_p3), %s1124_s20, %s965_s6 }
  0x28   : > { %s895_s10 = sshll.u32 (%p1214_p3), %s276_s9, 3  ;;  %s274_s14 = scalar_lea.vmem (%p1214_p3), [#allocation4], %s964_s7 }
  0x29   : > { %s278_s13 = scalar_lea.vmem %s1470_s1, %s895_s10 }
  0x2a   : > { %v331_v13 = vld [vmem:[%s278_s13] sm:$0xff]  ;;  %v333_v14 = vld [vmem:[%s278_s13 + $0x10] sm:$0xff] }
  0x2b   : > { %v335_v15 = vld [vmem:[%s278_s13 + $0x20] sm:$0xff]  ;;  %332 = vst [vmem:[%s274_s14] sm:$0xff] %v331_v13  ;;  %334 = vst [vmem:[%s274_s14 + $0x8] sm:$0xff] %v333_v14  ;;  %v337_v16 = vld [vmem:[%s278_s13 + $0x30] sm:$0xff] }
  0x2c   : > { %336 = vst [vmem:[%s274_s14 + $0x10] sm:$0xff] %v335_v15  ;;  %v339_v17 = vld [vmem:[%s278_s13 + $0x40] sm:$0xff]  ;;  %v341_v18 = vld [vmem:[%s278_s13 + $0x50] sm:$0xff]  ;;  %338 = vst [vmem:[%s274_s14 + $0x18] sm:$0xff] %v337_v16 }
  0x2d   : > { %340 = vst [vmem:[%s274_s14 + $0x20] sm:$0xff] %v339_v17  ;;  %342 = vst [vmem:[%s274_s14 + $0x28] sm:$0xff] %v341_v18  ;;  %v343_v19 = vld [vmem:[%s278_s13 + $0x60] sm:$0xff]  ;;  %v345_v20 = vld [vmem:[%s278_s13 + $0x70] sm:$0xff] }
  0x2e   : > { %v347_v21 = vld [vmem:[%s278_s13 + $0x80] sm:$0xff]  ;;  %344 = vst [vmem:[%s274_s14 + $0x30] sm:$0xff] %v343_v19  ;;  %346 = vst [vmem:[%s274_s14 + $0x38] sm:$0xff] %v345_v20  ;;  %v349_v22 = vld [vmem:[%s278_s13 + $0x90] sm:$0xff] }
  0x2f   : > { %348 = vst [vmem:[%s274_s14 + $0x40] sm:$0xff] %v347_v21  ;;  %v351_v23 = vld [vmem:[%s278_s13 + $0xa0] sm:$0xff]  ;;  %v353_v24 = vld [vmem:[%s278_s13 + $0xb0] sm:$0xff]  ;;  %350 = vst [vmem:[%s274_s14 + $0x48] sm:$0xff] %v349_v22 }
  0x30   : > { %352 = vst [vmem:[%s274_s14 + $0x50] sm:$0xff] %v351_v23  ;;  %354 = vst [vmem:[%s274_s14 + $0x58] sm:$0xff] %v353_v24  ;;  %v355_v25 = vld [vmem:[%s278_s13 + $0xc0] sm:$0xff] }
  0x31   : > { %356 = vst [vmem:[%s274_s14 + $0x60] sm:$0xff] %v355_v25 }
  0x32 PF: > { %p896_p12 = scmp.ge.s32.totalorder %s1132_s22, 1  ;;  %p361_p13 = scmp.lt.s32.totalorder %s1132_s22, 5 }
  0x34   : > { %p362_p0 = pnand %p896_p12, %p361_p13 }
  0x35   : > { %s1256_s28 = sand.u32 (!%p362_p0), 1, %s1108_s16   ;;  %s915_s13 = sshll.u32 (!%p362_p0), %s1120_s19, 1 }
  0x36   : > { %365 = sbr.rel (%p362_p0) target bundleno = 593 (0x251), region = 104  ;;  %s897_s12 = sshll.u32 (!%p362_p0), %s1256_s28, 1 }
  0x37   : > { %s966_s27 = smul.u32 (!%p362_p0), 104, %s1256_s28  ;;  %s786_s14 = sadd.s32 (!%p362_p0), %s1116_s18, %s915_s13 }
  0x38   : > { %s403_s23 = scalar_lea.vmem (!%p362_p0), [#allocation5], %s897_s12  ;;  %s775_s9 = scalar_lea.sflag (!%p362_p0), [#allocation6], %s1256_s28 }
  0x39   : > { %s1265_s5 = scalar_lea.vmem (!%p362_p0), [#allocation4], %s966_s27  ;;  %s370_s6 = scalar_lea.vmem (!%p362_p0), [#allocation3], %s966_s27 }
  0x3a   : > { %s790_s24 = sshll.u32 (!%p362_p0), %s403_s23, 4  ;;  %s916_s27 = sshll.u32 (!%p362_p0), %s786_s14, 5  ;;  %s1413_s24 = int_to_ptr.vmem [resolvable:$true] %s790_s24 }
  0x3b   : > { %v482_v26 = vld [vmem:[%s1471_s2 + $0x8] sm:$0xff]  ;;  %vm507_vm0 = vcmask 556032   ;;  %v1134_v27 = vmov 0.0   ;;  %v433_v29 = vld [vmem:[%s1265_s5 + $0x18] sm:$0xff]  ;;  %v430_v31 = vld [vmem:[%s1265_s5] sm:$0xff]  ;;  %vm547_vm1 = vcmask 1043456   ;;  %s1418_s7 = scalar_lea.hbm %s1473_s4, %s916_s27 }
  0x3c   : > { %551 = vmatprep.subr.mxu0 %v1134_v27  ;;  %899 = vmatprep.mubr.msk.f32.mxu0 %vm507_vm0, %v482_v26  ;;  %v432_v28 = vld [vmem:[%s1265_s5 + $0x10] sm:$0xff]  ;;  %v431_v30 = vld [vmem:[%s1265_s5 + $0x8] sm:$0xff]  ;;  %446 = vst [vmem:[#allocation2 + $0x7a] sm:$0xff] %v433_v29  ;;  %443 = vst [vmem:[#allocation2 + $0x62] sm:$0xff] %v430_v31  ;;  %vm1135_vm2 = vmmov 0   ;;  %vm699_vm3 = vcmask 1041408  }
  0x3d   : > { %933 = vmatprep.subr.mxu1 %v1134_v27  ;;  %445 = vst [vmem:[#allocation2 + $0x72] sm:$0xff] %v432_v28  ;;  %444 = vst [vmem:[#allocation2 + $0x6a] sm:$0xff] %v431_v30  ;;  %v416_v32 = vld [vmem:[%s370_s6 + $0x60] sm:$0x3]  ;;  %v415_v33 = vld [vmem:[%s370_s6 + $0x58] sm:$0xff]  ;;  %959 = vmatprep.mubr.msk.f32.mxu1 %vm1135_vm2, %v1134_v27  ;;  %vm695_vm4 = vcmask 801792  }
  0x3e   : > { %429 = vst [vmem:[#allocation2 + $0x60] sm:$0x3] %v416_v32  ;;  %v414_v34 = vld [vmem:[%s370_s6 + $0x50] sm:$0xff]  ;;  %v413_v35 = vld [vmem:[%s370_s6 + $0x48] sm:$0xff]  ;;  %v412_v36 = vld [vmem:[%s370_s6 + $0x40] sm:$0xff]  ;;  %s1040_s10 = scalar_lea.vmem %s1413_s24, 32 }
  0x3f   : > { %v411_v37 = vld [vmem:[%s370_s6 + $0x38] sm:$0xff]  ;;  %v410_v38 = vld [vmem:[%s370_s6 + $0x30] sm:$0xff]  ;;  %v409_v39 = vld [vmem:[%s370_s6 + $0x28] sm:$0xff]  ;;  %p1041_p1 = scmp.ne.s32.totalorder %s1413_s24, %s1040_s10  ;;  %s1136_s18 = smov [#allocation5]  }
  0x40   : > { %v408_v40 = vld [vmem:[%s370_s6 + $0x20] sm:$0xff]  ;;  %v407_v41 = vld [vmem:[%s370_s6 + $0x18] sm:$0xff]  ;;  %v406_v42 = vld [vmem:[%s370_s6 + $0x10] sm:$0xff]  ;;  %s1044_s19 = sshll.u32 %s1136_s18, 4  ;;  %s1045_s19 = int_to_ptr.vmem [resolvable:$false] %s1044_s19 }
  0x41   : > { %v405_v43 = vld [vmem:[%s370_s6 + $0x8] sm:$0xff]  ;;  %v404_v44 = vld [vmem:[%s370_s6] sm:$0xff]  ;;  %v442_v46 = vld [vmem:[%s1265_s5 + $0x60] sm:$0x3]  ;;  %p1042_p2 = pnand %p1041_p1, %p1222_p8  ;;  %s1046_s11 = scalar_lea.vmem %s1045_s19, 64 }
  0x42   : > { %v441_v45 = vld [vmem:[%s1265_s5 + $0x58] sm:$0xff]  ;;  %v440_v47 = vld [vmem:[%s1265_s5 + $0x50] sm:$0xff]  ;;  %v439_v48 = vld [vmem:[%s1265_s5 + $0x48] sm:$0xff]  ;;  %455 = vst [vmem:[#allocation2 + $0xc2] sm:$0x3] %v442_v46  ;;  %p1047_p4 = scmp.lt.s32.totalorder %s1413_s24, %s1045_s19  ;;  %p1048_p5 = scmp.lt.s32.totalorder %s1046_s11, %s1040_s10 }
  0x43   : > { %454 = vst [vmem:[#allocation2 + $0xba] sm:$0xff] %v441_v45  ;;  %453 = vst [vmem:[#allocation2 + $0xb2] sm:$0xff] %v440_v47  ;;  %v438_v49 = vld [vmem:[%s1265_s5 + $0x40] sm:$0xff]  ;;  %v437_v50 = vld [vmem:[%s1265_s5 + $0x38] sm:$0xff]  ;;  %p1043_p3 = pneg %p1042_p2 }
  0x44   : > { %452 = vst [vmem:[#allocation2 + $0xaa] sm:$0xff] %v439_v48  ;;  %v436_v51 = vld [vmem:[%s1265_s5 + $0x30] sm:$0xff]  ;;  %v471_v52 = vld [vmem:[#allocation2 + $0x78] sm:$0xff]  ;;  %451 = vst [vmem:[#allocation2 + $0xa2] sm:$0xff] %v438_v49  ;;  %p1049_p6 = por %p1048_p5, %p1047_p4 }
  0x45   : > { %v470_v53 = vld [vmem:[#allocation2 + $0x70] sm:$0xff]  ;;  %450 = vst [vmem:[#allocation2 + $0x9a] sm:$0xff] %v437_v50  ;;  %449 = vst [vmem:[#allocation2 + $0x92] sm:$0xff] %v436_v51  ;;  %v435_v54 = vld [vmem:[%s1265_s5 + $0x28] sm:$0xff]  ;;  %552 = vmatpush1.msra.mxu0 %v471_v52 }
  0x46   : > { %448 = vst [vmem:[#allocation2 + $0x8a] sm:$0xff] %v435_v54  ;;  %v434_v55 = vld [vmem:[%s1265_s5 + $0x20] sm:$0xff]  ;;  %553 = vmatprep.subr.mxu0 %v1134_v27  ;;  %v469_v56 = vld [vmem:[#allocation2 + $0x68] sm:$0xff]  ;;  %v483_v5 = vld [vmem:[%s1471_s2 + $0x10] sm:$0xff]  ;;  %p1050_p7 = pnand %p1049_p6, %p1043_p3 }
  0x47   : > { %447 = vst [vmem:[#allocation2 + $0x82] sm:$0xff] %v434_v55  ;;  %554 = vmatpush1.msra.mxu0 %v470_v53  ;;  %v468_v57 = vld [vmem:[#allocation2 + $0x60] sm:$0xff]  ;;  %v484_v4 = vld [vmem:[%s1471_s2 + $0x18] sm:$0xff]  ;;  %v486_v6 = vld [vmem:[%s1471_s2 + $0x28] sm:$0xff] }
  0x48   : > { %555 = vmatprep.subr.mxu0 %v1134_v27  ;;  %v481_v3 = vld [vmem:[%s1471_s2] sm:$0xff]  ;;  %v488_v8 = vld [vmem:[%s1471_s2 + $0x38] sm:$0xff]  ;;  %v487_v9 = vld [vmem:[%s1471_s2 + $0x30] sm:$0xff] }
  0x49   : > { %556 = vmatpush1.msra.mxu0 %v469_v56  ;;  %v485_v7 = vld [vmem:[%s1471_s2 + $0x20] sm:$0xff]  ;;  %v490_v10 = vld [vmem:[%s1471_s2 + $0x48] sm:$0xff]  ;;  %v492_v12 = vld [vmem:[%s1471_s2 + $0x58] sm:$0xff] }
  0x4a   : > { %557 = vmatprep.subr.mxu0 %v1134_v27  ;;  %v480_v58 = vld [vmem:[#allocation2 + $0xc0] sm:$0xf]  ;;  %v479_v59 = vld [vmem:[#allocation2 + $0xb8] sm:$0xff]  ;;  %v491_v13 = vld [vmem:[%s1471_s2 + $0x50] sm:$0xff] }
  0x4b   : > { %558 = vmatpush1.msra.mxu0 %v468_v57  ;;  %v478_v60 = vld [vmem:[#allocation2 + $0xb0] sm:$0xff]  ;;  %v477_v61 = vld [vmem:[#allocation2 + $0xa8] sm:$0xff]  ;;  %v489_v11 = vld [vmem:[%s1471_s2 + $0x40] sm:$0xff] }
  0x4c   : > { %559 = vmatprep.subr.mxu0 %v1134_v27  ;;  %v476_v62 = vld [vmem:[#allocation2 + $0xa0] sm:$0xff]  ;;  %v475_v63 = vld [vmem:[#allocation2 + $0x98] sm:$0xff]  ;;  %v494_v14 = vld [vmem:[%s1471_s2 + $0x68] sm:$0xff] }
  0x4d   : > { %560 = vmatpush1.msra.mxu0 %v415_v33  ;;  %v474_v0 = vld [vmem:[#allocation2 + $0x90] sm:$0xff]  ;;  %v493_v15 = vld [vmem:[%s1471_s2 + $0x60] sm:$0xff]  ;;  %v496_v16 = vld [vmem:[%s1471_s2 + $0x78] sm:$0xff] }
  0x4e   : > { %561 = vmatprep.subr.mxu0 %v1134_v27  ;;  %v473_v1 = vld [vmem:[#allocation2 + $0x88] sm:$0xff]  ;;  %v472_v2 = vld [vmem:[#allocation2 + $0x80] sm:$0xff]  ;;  %v495_v17 = vld [vmem:[%s1471_s2 + $0x70] sm:$0xff] }
  0x4f   : > { %562 = vmatpush1.msra.mxu0 %v414_v34  ;;  %v498_v18 = vld [vmem:[%s1471_s2 + $0x88] sm:$0xff]  ;;  %v497_v19 = vld [vmem:[%s1471_s2 + $0x80] sm:$0xff]  ;;  %v500_v20 = vld [vmem:[%s1471_s2 + $0x98] sm:$0xff] }
  0x50   : > { %563 = vmatprep.subr.mxu0 %v1134_v27  ;;  %v499_v21 = vld [vmem:[%s1471_s2 + $0x90] sm:$0xff]  ;;  %v502_v22 = vld [vmem:[%s1471_s2 + $0xa8] sm:$0xff]  ;;  %v501_v23 = vld [vmem:[%s1471_s2 + $0xa0] sm:$0xff] }
  0x51   : > { %564 = vmatpush1.msra.mxu0 %v413_v35  ;;  %v504_v24 = vld [vmem:[%s1471_s2 + $0xb8] sm:$0xff]  ;;  %v503_v25 = vld [vmem:[%s1471_s2 + $0xb0] sm:$0xff]  ;;  %v506_v26 = vld [vmem:[%s1471_s2 + $0xc8] sm:$0x3] }
  0x52   : > { %565 = vmatprep.subr.mxu0 %v1134_v27  ;;  %v505_v28 = vld [vmem:[%s1471_s2 + $0xc0] sm:$0x3] }
  0x53   : > { %566 = vmatpush1.msra.mxu0 %v412_v36 }
  0x54   : > { %567 = vmatprep.subr.mxu0 %v1134_v27 }
  0x55   : > { %568 = vmatpush1.msra.mxu0 %v411_v37 }
  0x56   : > { %569 = vmatprep.subr.mxu0 %v1134_v27 }
  0x57   : > { %570 = vmatpush1.msra.mxu0 %v410_v38 }
  0x58   : > { %571 = vmatprep.subr.mxu0 %v1134_v27 }
  0x59   : > { %572 = vmatpush1.msra.mxu0 %v409_v39 }
  0x5a   : > { %573 = vmatprep.subr.mxu0 %v1134_v27 }
  0x5b   : > { %574 = vmatpush1.msra.mxu0 %v408_v40 }
  0x5c   : > { %575 = vmatprep.subr.mxu0 %v1134_v27 }
  0x5d   : > { %576 = vmatpush1.msra.mxu0 %v407_v41 }
  0x5e   : > { %577 = vmatprep.subr.mxu0 %v1134_v27 }
  0x5f   : > { %578 = vmatpush1.msra.mxu0 %v406_v42 }
  0x60   : > { %579 = vmatprep.subr.mxu0 %v1134_v27 }
  0x61   : > { %580 = vmatpush1.msra.mxu0 %v405_v43 }
  0x62   : > { %581 = vmatprep.subr.mxu0 %v1134_v27 }
  0x63   : > { %582 = vmatpush1.msra.mxu0 %v404_v44 }
  0x64   : > { %597 = vmatprep.subr.mxu0 %v1134_v27 }
  0x65   : > { %898 = vmatpush2.msk.msra.mxu0 %vm547_vm1, %v480_v58 }
  0x66   : > { %599 = vmatprep.subr.mxu0 %v1134_v27 }
  0x67   : > { %600 = vmatpush2.msra.mxu0 %v479_v59 }
  0x68   : > { %601 = vmatprep.subr.mxu0 %v1134_v27 }
  0x69   : > { %602 = vmatpush2.msra.mxu0 %v478_v60 }
  0x6a   : > { %603 = vmatprep.subr.mxu0 %v1134_v27 }
  0x6b   : > { %604 = vmatpush2.msra.mxu0 %v477_v61 }
  0x6c   : > { %605 = vmatprep.subr.mxu0 %v1134_v27 }
  0x6d   : > { %606 = vmatpush2.msra.mxu0 %v476_v62 }
  0x6e   : > { %607 = vmatprep.subr.mxu0 %v1134_v27 }
  0x6f   : > { %608 = vmatpush2.msra.mxu0 %v475_v63 }
  0x70   : > { %609 = vmatprep.subr.mxu0 %v1134_v27 }
  0x71   : > { %610 = vmatpush2.msra.mxu0 %v474_v0 }
  0x72   : > { %611 = vmatprep.subr.mxu0 %v1134_v27 }
  0x73   : > { %612 = vmatpush2.msra.mxu0 %v473_v1 }
  0x74   : > { %613 = vmatprep.subr.mxu0 %v1134_v27 }
  0x75   : > { %614 = vmatpush2.msra.mxu0 %v472_v2 }
  0x76   : > { %616 = vmatmul.mubr.f32.vlgmr.msra.gmra.mxu0 %v481_v3 }
  0x77   : > { %900 = vmatprep.mubr.msk.f32.mxu0 %vm507_vm0, %v484_v4  ;;  %v694_v4 = vld [vmem:[%s1472_s3] sm:$0x3] }
  0x7a   : > { %621 = vmatmul.mubr.f32.gmra.mxu0 %v483_v5 }
  0x7b   : > { %901 = vmatprep.mubr.msk.f32.mxu0 %vm507_vm0, %v486_v6 }
  0x7e   : > { %626 = vmatmul.mubr.f32.gmra.mxu0 %v485_v7 }
  0x7f   : > { %902 = vmatprep.mubr.msk.f32.mxu0 %vm507_vm0, %v488_v8 }
  0x82   : > { %631 = vmatmul.mubr.f32.gmra.mxu0 %v487_v9 }
  0x83   : > { %903 = vmatprep.mubr.msk.f32.mxu0 %vm507_vm0, %v490_v10 }
  0x86   : > { %636 = vmatmul.mubr.f32.gmra.mxu0 %v489_v11 }
  0x87   : > { %904 = vmatprep.mubr.msk.f32.mxu0 %vm507_vm0, %v492_v12 }
  0x8a   : > { %641 = vmatmul.mubr.f32.gmra.mxu0 %v491_v13 }
  0x8b   : > { %905 = vmatprep.mubr.msk.f32.mxu0 %vm507_vm0, %v494_v14 }
  0x8e   : > { %646 = vmatmul.mubr.f32.gmra.mxu0 %v493_v15 }
  0x8f   : > { %906 = vmatprep.mubr.msk.f32.mxu0 %vm507_vm0, %v496_v16 }
  0x92   : > { %651 = vmatmul.mubr.f32.gmra.mxu0 %v495_v17 }
  0x93   : > { %907 = vmatprep.mubr.msk.f32.mxu0 %vm507_vm0, %v498_v18 }
  0x96   : > { %656 = vmatmul.mubr.f32.gmra.mxu0 %v497_v19 }
  0x97   : > { %908 = vmatprep.mubr.msk.f32.mxu0 %vm507_vm0, %v500_v20 }
  0x9a   : > { %661 = vmatmul.mubr.f32.gmra.mxu0 %v499_v21 }
  0x9b   : > { %909 = vmatprep.mubr.msk.f32.mxu0 %vm507_vm0, %v502_v22 }
  0x9e   : > { %666 = vmatmul.mubr.f32.gmra.mxu0 %v501_v23 }
  0x9f   : > { %910 = vmatprep.mubr.msk.f32.mxu0 %vm507_vm0, %v504_v24 }
  0xa2   : > { %671 = vmatmul.mubr.f32.gmra.mxu0 %v503_v25 }
  0xa3   : > { %911 = vmatprep.mubr.msk.f32.mxu0 %vm507_vm0, %v506_v26 }
  0xa6   : > { %676 = vmatmul.mubr.f32.gmra.mxu0 %v505_v28 }
 0x136   : > { %v1392_v29 = vpop.f32.mrf.mxu0 }
 0x137   : > { %v681_v3 = vmax.f32 %v1392_v29, 0.0 }
 0x138   : > { %v619_v30 = vpop.f32.mrf.mxu0 }
 0x13a   : > { %v622_v31 = vpop.f32.mrf.mxu0 }
 0x13b   : > { %v682_v2 = vmax.f32 %v622_v31, 0.0 }
 0x13c   : > { %v624_v32 = vpop.f32.mrf.mxu0 }
 0x13e   : > { %v627_v33 = vpop.f32.mrf.mxu0 }
 0x13f   : > { %v683_v1 = vmax.f32 %v627_v33, 0.0 }
 0x140   : > { %v629_v34 = vpop.f32.mrf.mxu0 }
 0x142   : > { %v632_v35 = vpop.f32.mrf.mxu0 }
 0x143   : > { %v684_v0 = vmax.f32 %v632_v35, 0.0 }
 0x144   : > { %v634_v36 = vpop.f32.mrf.mxu0 }
 0x146   : > { %v637_v37 = vpop.f32.mrf.mxu0 }
 0x147   : > { %v685_v63 = vmax.f32 %v637_v37, 0.0 }
 0x148   : > { %v639_v38 = vpop.f32.mrf.mxu0 }
 0x14a   : > { %v642_v39 = vpop.f32.mrf.mxu0 }
 0x14b   : > { %v686_v62 = vmax.f32 %v642_v39, 0.0 }
 0x14c   : > { %v644_v40 = vpop.f32.mrf.mxu0 }
 0x14e   : > { %v647_v41 = vpop.f32.mrf.mxu0 }
 0x14f   : > { %v687_v61 = vmax.f32 %v647_v41, 0.0 }
 0x150   : > { %v649_v42 = vpop.f32.mrf.mxu0 }
 0x152   : > { %v652_v43 = vpop.f32.mrf.mxu0 }
 0x153   : > { %v688_v60 = vmax.f32 %v652_v43, 0.0 }
 0x154   : > { %v654_v44 = vpop.f32.mrf.mxu0 }
 0x156   : > { %v657_v45 = vpop.f32.mrf.mxu0 }
 0x157   : > { %v689_v59 = vmax.f32 %v657_v45, 0.0 }
 0x158   : > { %v659_v46 = vpop.f32.mrf.mxu0 }
 0x15a   : > { %v662_v47 = vpop.f32.mrf.mxu0 }
 0x15b   : > { %v690_v58 = vmax.f32 %v662_v47, 0.0 }
 0x15c   : > { %v664_v48 = vpop.f32.mrf.mxu0 }
 0x15e   : > { %v667_v49 = vpop.f32.mrf.mxu0 }
 0x15f   : > { %v691_v57 = vmax.f32 %v667_v49, 0.0 }
 0x160   : > { %v669_v50 = vpop.f32.mrf.mxu0 }
 0x162   : > { %v672_v51 = vpop.f32.mrf.mxu0 }
 0x163   : > { %v692_v56 = vmax.f32 %v672_v51, 0.0 }
 0x164   : > { %v674_v52 = vpop.f32.mrf.mxu0 }
 0x166   : > { %v677_v53 = vpop.f32.mrf.mxu0 }
 0x167   : > { %v693_v54 = vmax.f32 %v677_v53, 0.0 }
 0x168   : > { %v679_v55 = vpop.f32.mrf.mxu0 }
 0x169   : > { %934 = vmatpush3.msk.msra.mxu1 %vm699_vm3, %v693_v54 }
 0x16a   : > { %935 = vmatprep.subr.mxu1 %v1134_v27 }
 0x16b   : > { %936 = vmatpush3.msra.mxu1 %v692_v56 }
 0x16c   : > { %937 = vmatprep.subr.mxu1 %v1134_v27 }
 0x16d   : > { %938 = vmatpush3.msra.mxu1 %v691_v57 }
 0x16e   : > { %939 = vmatprep.subr.mxu1 %v1134_v27 }
 0x16f   : > { %940 = vmatpush3.msra.mxu1 %v690_v58 }
 0x170   : > { %941 = vmatprep.subr.mxu1 %v1134_v27 }
 0x171   : > { %942 = vmatpush3.msra.mxu1 %v689_v59 }
 0x172   : > { %943 = vmatprep.subr.mxu1 %v1134_v27 }
 0x173   : > { %944 = vmatpush3.msra.mxu1 %v688_v60 }
 0x174   : > { %945 = vmatprep.subr.mxu1 %v1134_v27 }
 0x175   : > { %946 = vmatpush3.msra.mxu1 %v687_v61 }
 0x176   : > { %947 = vmatprep.subr.mxu1 %v1134_v27 }
 0x177   : > { %948 = vmatpush3.msra.mxu1 %v686_v62 }
 0x178   : > { %949 = vmatprep.subr.mxu1 %v1134_v27 }
 0x179   : > { %950 = vmatpush3.msra.mxu1 %v685_v63 }
 0x17a   : > { %951 = vmatprep.subr.mxu1 %v1134_v27 }
 0x17b   : > { %952 = vmatpush3.msra.mxu1 %v684_v0 }
 0x17c   : > { %953 = vmatprep.subr.mxu1 %v1134_v27 }
 0x17d   : > { %954 = vmatpush3.msra.mxu1 %v683_v1 }
 0x17e   : > { %955 = vmatprep.subr.mxu1 %v1134_v27 }
 0x17f   : > { %956 = vmatpush3.msra.mxu1 %v682_v2 }
 0x180   : > { %957 = vmatprep.subr.mxu1 %v1134_v27 }
 0x181   : > { %958 = vmatpush3.msra.mxu1 %v681_v3 }
 0x182   : > { %960 = vmatmul.mubr.msk.f32.vlgmr.msra.gmra.mxu1 %vm695_vm4, %v694_v4 }
 0x242   : > { %v769_v27 = vpop.f32.mrf.mxu1 }
 0x243   : > { %773 = vst [vmem:[%s403_s23] sm:$0x3] %v769_v27 }
 0x244   : > { %v961_v5 = vpop.f32.mrf.mxu1 }
 0x245   : > { %1053 = shalt.err (!%p1050_p7)
}
 0x246   : > { %s1054_s12 = scalar_lea.hbm %s1418_s7, 32  ;;  %s1058_s14 = scalar_lea.hbm %s1473_s4, 128 }
 0x247   : > { %p1055_p10 = scmp.ne.s32.totalorder %s1418_s7, %s1054_s12  ;;  %p1059_p13 = scmp.lt.s32.totalorder %s1418_s7, %s1473_s4 }
 0x248   : > { %p1060_p0 = scmp.lt.s32.totalorder %s1058_s14, %s1054_s12 }
 0x249   : > { %p1056_p11 = pnand %p1055_p10, %p1222_p8 }
 0x24a   : > { %p1061_p1 = por %p1060_p0, %p1059_p13 }
 0x24b   : > { %p1057_p12 = pneg %p1056_p11 }
 0x24d   : > { %p1062_p2 = pnand %p1061_p1, %p1057_p12 }
 0x24f   : > { %1065 = shalt.err (!%p1062_p2)
}
 0x250   : > { %967 = dma.vmem_to_hbm [thread:$0]  (%p1222_p8), %s1413_s24, 32, %s1418_s7, %s775_s9  }
 0x251 PF: > { %p973_p3 = scmp.ge.s32.totalorder %s1132_s22, 2  ;;  %s802_s5 = sand.u32 1, %s1104_s15  }
 0x252   : > { %s803_s6 = scalar_lea.sflag [#allocation6], %s802_s5 }
 0x253   : > { %p970_p4 = pnand %p973_p3, %p1226_p9 }
 0x255   : > { %p971_p5 = pneg %p970_p4 }
 0x257   : > { %1099 = dma.done.wait (%p971_p5), %s803_s6, 32  }
 0x258   : > { %1101 = vsyncadd (%p971_p5), %s803_s6, 4294967264  ;;  %s17_s22 = sadd.s32 1, %s1132_s22   ;;  %s1477_s15 = smov %s1108_s16 }
 0x259   : > { %p14_p6 = scmp.ge.s32.totalorder %s17_s22, 6   ;;  %s1478_s16 = smov %s1112_s17 }
 0x25a   : > { %s1479_s17 = smov %s1234_s8  ;;  %s1480_s18 = smov %s1124_s20 }
 0x25b   : > { %s1481_s19 = smov %s1128_s21  ;;  %s1482_s20 = smov %s1485_s25 }
 0x25c   : > { %s1483_s21 = smov %s1489_s26  ;;  %16 = sbr.rel (!%p14_p6) target bundleno = 5 (0x5), region = 160 }
 0x261   :  { %808 = vsyncpa [#allocation6], 1 }
 0x262   :  { %810 = vsyncpa [#allocation6 + $0x1], 1 }

</bundles_post_ra>
